<compile_context>
chip_gen: v7x
topology: tpu7x:2x2x1
jax: 0.10.0
libtpu: 0.0.40
codegen_flags: <defaults>
</compile_context>

<pallas_src>
import functools

import jax
import jax.numpy as jnp
from jax.experimental import pallas as pl
from jax.experimental.pallas import tpu as pltpu


# ----------------------------------------------------------------------------
# Kernel
# ----------------------------------------------------------------------------
def _wavefront_lstm_kernel(x_ref, wslab_ref, misc_ref, hc_ref, out_ref, *,
                           hidden_size, num_layers, seq_len, batch, in_pad):
    """Wavefronted multi-layer LSTM + LeakyReLU + folded (lin2 o lin1).

    Shapes seen by the kernel (all resident in VMEM):
      x_ref    : (T*B, IP)        bf16, time-major rows, zero-padded input
      wslab_ref: (IP + L*H, G)    bf16, G = 4*L*H
                   rows [0, IP)        : layer-0 input->gate weights (scattered, 0.5-scaled)
                   rows [IP, IP+L*H)   : block-structured recurrent weights
                                         (Whh_l into layer-l gate cols, Wih_{l+1} into
                                          layer-(l+1) gate cols)
      misc_ref : (2, G) f32: row 0 = summed gate biases, row 1[:H] = folded output weight,
                 row 1[H] = folded output bias
      hc_ref   : (2L, B, H) f32:  rows [0,L) = h0 per layer, rows [L,2L) = c0 per layer
      out_ref  : (B, 1) f32

    Combined gate column layout (each block H wide):
      [ i_0..i_{L-1} | f_0..f_{L-1} | o_0..o_{L-1} | g_0..g_{L-1} ]
    i/f/o columns are pre-scaled by 0.5 so sigmoid(z) = 0.5*tanh(z_scaled) + 0.5.
    """
    H, L, T, B, IP = hidden_size, num_layers, seq_len, batch, in_pad
    G = 4 * L * H
    LH = L * H

    wx = wslab_ref[0:IP, :]                    # (IP, G) bf16
    w_rec = wslab_ref[IP:IP + LH, :]           # (LH, G) bf16

    b_all = misc_ref[0:1, :]                   # (1, G) f32
    w_out = misc_ref[1:2, 0:H]                 # (1, H) f32 (lin2 folded into lin1)
    b_out = misc_ref[1:2, H:H + 1]             # (1, 1) f32

    # Hoisted: layer-0 input->gate projection for ALL timesteps (one MXU pass),
    # with all gate biases folded in.
    gih = jnp.dot(x_ref[...], wx, preferred_element_type=jnp.float32) + b_all   # (T*B, G)

    # Initial combined states  h = [h_0 | h_1 | ...],  c = [c_0 | c_1 | ...]   (B, L*H)
    h = jnp.concatenate([hc_ref[l] for l in range(L)], axis=-1)
    c = jnp.concatenate([hc_ref[L + l] for l in range(L)], axis=-1)

    lane = jax.lax.broadcasted_iota(jnp.int32, (B, LH), 1)

    # Wavefront: wave w runs layer l at time t = w - l  (active iff l <= w <= l + T - 1).
    for w in range(T + L - 1):                                   # static unroll, 9 waves
        hb = h.astype(jnp.bfloat16)                              # bf16 MXU operand only
        gates = jnp.dot(hb, w_rec, preferred_element_type=jnp.float32)   # (B, G) f32
        if w < T:
            gates = gates + gih[w * B:(w + 1) * B, :]            # includes biases
        else:
            gates = gates + b_all                                # layer-0 part masked below
        y = jnp.tanh(gates)                                      # EUP push #1
        sig = 0.5 * y[:, :3 * LH] + 0.5                          # sigmoid via tanh
        i_g = sig[:, 0:LH]
        f_g = sig[:, LH:2 * LH]
        o_g = sig[:, 2 * LH:3 * LH]
        g_g = y[:, 3 * LH:]
        c_new = f_g * c + i_g * g_g
        h_new = o_g * jnp.tanh(c_new)                            # EUP push #2

        lo = max(0, w - T + 1)                                   # first active layer
        hi = min(L - 1, w)                                       # last active layer
        if lo == 0 and hi == L - 1:                              # interior waves: all active
            h, c = h_new, c_new
        else:                                                    # edge waves: mask lanes
            active = (lane >= lo * H) & (lane < (hi + 1) * H)
            h = jnp.where(active, h_new, h)
            c = jnp.where(active, c_new, c)

    # output[-1] depends only on the top layer's final hidden state.
    h_top = h[:, (L - 1) * H:L * H]                              # (B, H)
    act = jnp.where(h_top > 0, h_top, 0.01 * h_top)              # LeakyReLU(0.01)
    out_ref[...] = jnp.sum(act * w_out, axis=-1, keepdims=True) + b_out


# ----------------------------------------------------------------------------
# One-time parameter preparation (cache the result; do NOT call per forward)
# ----------------------------------------------------------------------------
def _scatter_gates(w4, l, L, H):
    """Map a (rows, 4H) matrix in PyTorch gate order [i,f,g,o] into the combined
    (rows, 4*L*H) layout [i_*|f_*|o_*|g_*] for layer l, pre-scaling i/f/o by 0.5."""
    rows = w4.shape[0]
    out = jnp.zeros((rows, 4 * L * H), jnp.float32)
    # (torch block, combined group, scale)
    for src_blk, grp, scale in ((0, 0, 0.5), (1, 1, 0.5), (3, 2, 0.5), (2, 3, 1.0)):
        dst = (grp * L + l) * H
        out = out.at[:, dst:dst + H].set(
            scale * w4[:, src_blk * H:(src_blk + 1) * H].astype(jnp.float32))
    return out


def prepare_params(params):
    """Builds the packed kernel constants ONCE (cache across forward calls)."""
    wih_list, whh_list, bih_list, bhh_list, w1, b1, w2, b2 = params
    L = len(wih_list)
    H = whh_list[0].shape[1]
    I = wih_list[0].shape[1]
    O = w1.shape[0]
    assert O == 1, "folded-linear epilogue assumes output_size == 1"
    G = 4 * L * H
    IP = max(16, ((I + 15) // 16) * 16)        # bf16 sublane-tile aligned input pad

    # layer-0 input->gate weights, scattered into the combined layout
    wx = jnp.zeros((IP, G), jnp.float32)
    wx = wx.at[0:I, :].set(_scatter_gates(wih_list[0].T, 0, L, H))

    # block-structured recurrent weight: rows of layer l feed its own gates (Whh_l)
    # and layer l+1's gates (Wih_{l+1}) — this is what enables the wavefront.
    w_rec = jnp.zeros((L * H, G), jnp.float32)
    for l in range(L):
        w_rec = w_rec.at[l * H:(l + 1) * H, :].add(_scatter_gates(whh_list[l].T, l, L, H))
        if l + 1 < L:
            w_rec = w_rec.at[l * H:(l + 1) * H, :].add(
                _scatter_gates(wih_list[l + 1].T, l + 1, L, H))

    wslab = jnp.concatenate([wx, w_rec], axis=0).astype(jnp.bfloat16)   # (IP + LH, G)

    # summed gate biases (b_ih + b_hh), scattered + 0.5-scaled for i/f/o
    b_all = jnp.zeros((G,), jnp.float32)
    for l in range(L):
        b_all = b_all + _scatter_gates(
            (bih_list[l] + bhh_list[l]).reshape(1, 4 * H), l, L, H)[0]

    # fold lin2 (1x1) into lin1:  y = w2 (w1 a + b1) + b2 = (w2 w1) a + (w2 b1 + b2)
    w_fold = (w2 @ w1).reshape(-1).astype(jnp.float32)                  # (H,)
    b_fold = (w2 @ b1 + b2).reshape(()).astype(jnp.float32)             # scalar

    misc = jnp.zeros((2, G), jnp.float32)
    misc = misc.at[0, :].set(b_all)
    misc = misc.at[1, 0:H].set(w_fold)
    misc = misc.at[1, H].set(b_fold)

    return (wslab, misc)


# ----------------------------------------------------------------------------
# Forward (per-call path: only input pad/reshape + pallas_call)
# ----------------------------------------------------------------------------
def bias_correction_rnn_forward(x, hidden, prepared):
    """Pallas-backed equivalent of bias_correction_RNN.forward(input, hidden).

    x        : (T, B, input_size) float32 (time-major, batch_first=False)
    hidden   : (h0, c0), each (num_layers, B, hidden_size)
    prepared : output of prepare_params(params)   (cached, NOT rebuilt per call)
    returns  : output[-1], shape (output_size,) = (1,)
    """
    wslab, misc = prepared
    h0, c0 = hidden
    T, B, I = x.shape
    L, _, H = h0.shape
    IP = wslab.shape[0] - L * H
    assert I <= IP

    # per-call glue (tiny, fuses under jit)
    x2d = jnp.pad(x.reshape(T * B, I), ((0, 0), (0, IP - I))).astype(jnp.bfloat16)
    hc = jnp.concatenate([h0, c0], axis=0).astype(jnp.float32)          # (2L, B, H)

    kernel = functools.partial(_wavefront_lstm_kernel, hidden_size=H, num_layers=L,
                               seq_len=T, batch=B, in_pad=IP)
    vmem = lambda: pl.BlockSpec(memory_space=pltpu.MemorySpace.VMEM)

    out = pl.pallas_call(
        kernel,
        out_shape=jax.ShapeDtypeStruct((B, 1), jnp.float32),
        in_specs=[vmem(), vmem(), vmem(), vmem()],
        out_specs=vmem(),
    )(x2d, wslab, misc, hc)

    # PyTorch: output.view(-1, H) ... return output[-1]  -> last (t, b) row.
    return out[-1]


# ----------------------------------------------------------------------------
# Pure-JAX reference (mirrors the PyTorch module exactly, f32 throughout)
# ----------------------------------------------------------------------------
def _reference_forward(x, hidden, params):
    h0, c0 = hidden
    wih_list, whh_list, bih_list, bhh_list, w1, b1, w2, b2 = params
    T, B, _ = x.shape
    L = len(wih_list)
    H = whh_list[0].shape[1]

    h = [h0[l] for l in range(L)]
    c = [c0[l] for l in range(L)]
    outs = []
    for t in range(T):
        x_t = x[t]
        for l in range(L):
            gates = (x_t @ wih_list[l].T + bih_list[l]
                     + h[l] @ whh_list[l].T + bhh_list[l])
            i_g = jax.nn.sigmoid(gates[:, 0 * H:1 * H])
            f_g = jax.nn.sigmoid(gates[:, 1 * H:2 * H])
            g_g = jnp.tanh(gates[:, 2 * H:3 * H])
            o_g = jax.nn.sigmoid(gates[:, 3 * H:4 * H])
            c[l] = f_g * c[l] + i_g * g_g
            h[l] = o_g * jnp.tanh(c[l])
            x_t = h[l]
        outs.append(x_t)
    out_r = jnp.stack(outs).reshape(-1, H)
    act = jnp.where(out_r > 0, out_r, 0.01 * out_r)
    y = act @ w1.T + b1
    y = y @ w2.T + b2
    return y[-1]


def _init_params(key, input_size, hidden_size, num_layers, output_size):
    """Deterministic parameter init (same shapes/ranges as the PyTorch module)."""
    H, I, L = hidden_size, input_size, num_layers
    k = 1.0 / jnp.sqrt(jnp.float32(H))
    keys = jax.random.split(key, 4 * L + 4)
    wih_list, whh_list, bih_list, bhh_list = [], [], [], []
    for l in range(L):
        in_f = I if l == 0 else H
        wih_list.append(jax.random.uniform(keys[4 * l + 0], (4 * H, in_f),
                                           jnp.float32, -k, k))
        whh_list.append(jax.random.uniform(keys[4 * l + 1], (4 * H, H),
                                           jnp.float32, -k, k))
        bih_list.append(jax.random.uniform(keys[4 * l + 2], (4 * H,),
                                           jnp.float32, -k, k))
        bhh_list.append(jax.random.uniform(keys[4 * l + 3], (4 * H,),
                                           jnp.float32, -k, k))
    w1 = jax.random.uniform(keys[-4], (output_size, H), jnp.float32, -k, k)
    b1 = jax.random.uniform(keys[-3], (output_size,), jnp.float32, -k, k)
    w2 = jax.random.uniform(keys[-2], (output_size, output_size),
                            jnp.float32, -1.0, 1.0)
    b2 = jax.random.uniform(keys[-1], (output_size,), jnp.float32, -1.0, 1.0)
    return (wih_list, whh_list, bih_list, bhh_list, w1, b1, w2, b2)


if __name__ == "__main__":
    # Shapes consistent with the module: settings.number_of_features=4,
    # settings.n_hidden=32, settings.NUM_LAYERS=2, output_size=1, batch=1, seq=8.
    T, B, I, H, L, O = 8, 1, 4, 32, 2, 1

    root = jax.random.PRNGKey(0)
    k_x, k_p = jax.random.split(root)
    x = jax.random.normal(k_x, (T, B, I), jnp.float32)

    params = _init_params(k_p, I, H, L, O)
    # initHidden(): zeros of shape (num_layers, 1, hidden_size)
    hidden = (jnp.zeros((L, B, H), jnp.float32),
              jnp.zeros((L, B, H), jnp.float32))

    prepared = prepare_params(params)          # one-time weight prep, cached across calls
    fwd = jax.jit(bias_correction_rnn_forward)

    out = jax.block_until_ready(fwd(x, hidden, prepared))

    ref = _reference_forward(x, hidden, params)
    assert out.shape == (O,), out.shape
    # bf16 MXU operands (f32 accumulate) => small numeric drift vs the f32 reference.
    assert jnp.allclose(out, ref, atol=3e-2, rtol=3e-2), (out, ref)

    print("KERNEL_OK")
</pallas_src>

<mosaic_0001>
module attributes {stable_mosaic.version = 11 : i64} {
  func.func @_wavefront_lstm_kernel(%arg0: memref<8x16xbf16, #tpu.memory_space<vmem>>, %arg1: memref<80x256xbf16, #tpu.memory_space<vmem>>, %arg2: memref<2x256xf32, #tpu.memory_space<vmem>>, %arg3: memref<4x1x32xf32, #tpu.memory_space<vmem>>, %arg4: memref<1x1xf32, #tpu.memory_space<vmem>>) attributes {dimension_semantics = [], scalar_prefetch = 0 : i64, scratch_operands = 0 : i64, tpu.core_type = #tpu.core_type<tc>} {
    %c0 = arith.constant 0 : index
    %c0_0 = arith.constant 0 : index
    %0 = vector.load %arg1[%c0, %c0_0] : memref<80x256xbf16, #tpu.memory_space<vmem>>, vector<16x256xbf16>
    %c16 = arith.constant 16 : index
    %c0_1 = arith.constant 0 : index
    %1 = vector.load %arg1[%c16, %c0_1] : memref<80x256xbf16, #tpu.memory_space<vmem>>, vector<64x256xbf16>
    %c0_2 = arith.constant 0 : index
    %c0_3 = arith.constant 0 : index
    %2 = vector.load %arg2[%c0_2, %c0_3] : memref<2x256xf32, #tpu.memory_space<vmem>>, vector<1x256xf32>
    %c1 = arith.constant 1 : index
    %c0_4 = arith.constant 0 : index
    %3 = vector.load %arg2[%c1, %c0_4] : memref<2x256xf32, #tpu.memory_space<vmem>>, vector<1x32xf32>
    %c1_5 = arith.constant 1 : index
    %c32 = arith.constant 32 : index
    %4 = vector.load %arg2[%c1_5, %c32] : memref<2x256xf32, #tpu.memory_space<vmem>>, vector<1x1xf32>
    %c0_6 = arith.constant 0 : index
    %c0_7 = arith.constant 0 : index
    %5 = vector.load %arg0[%c0_6, %c0_7] : memref<8x16xbf16, #tpu.memory_space<vmem>>, vector<8x16xbf16>
    %cst = arith.constant dense<0.000000e+00> : vector<8x256xf32>
    %6 = tpu.matmul %5, %0, %cst {dimension_numbers = #tpu.dot_dimension_numbers<[1], [0], [0], [1], [0, 0, 1, 1], [], []>} : vector<8x16xbf16>, vector<16x256xbf16>, vector<8x256xf32> -> vector<8x256xf32>
    %7 = vector.broadcast %2 : vector<1x256xf32> to vector<8x256xf32>
    %8 = arith.addf %6, %7 : vector<8x256xf32>
    %c0_8 = arith.constant 0 : index
    %c0_9 = arith.constant 0 : index
    %c0_10 = arith.constant 0 : index
    %9 = vector.load %arg3[%c0_8, %c0_9, %c0_10] : memref<4x1x32xf32, #tpu.memory_space<vmem>>, vector<1x1x32xf32>
    %10 = vector.shape_cast %9 : vector<1x1x32xf32> to vector<1x32xf32>
    %c1_11 = arith.constant 1 : index
    %c0_12 = arith.constant 0 : index
    %c0_13 = arith.constant 0 : index
    %11 = vector.load %arg3[%c1_11, %c0_12, %c0_13] : memref<4x1x32xf32, #tpu.memory_space<vmem>>, vector<1x1x32xf32>
    %12 = vector.shape_cast %11 : vector<1x1x32xf32> to vector<1x32xf32>
    %13 = tpu.concatenate %10, %12 in 1 : vector<1x32xf32>, vector<1x32xf32> -> vector<1x64xf32>
    %c2 = arith.constant 2 : index
    %c0_14 = arith.constant 0 : index
    %c0_15 = arith.constant 0 : index
    %14 = vector.load %arg3[%c2, %c0_14, %c0_15] : memref<4x1x32xf32, #tpu.memory_space<vmem>>, vector<1x1x32xf32>
    %15 = vector.shape_cast %14 : vector<1x1x32xf32> to vector<1x32xf32>
    %c3 = arith.constant 3 : index
    %c0_16 = arith.constant 0 : index
    %c0_17 = arith.constant 0 : index
    %16 = vector.load %arg3[%c3, %c0_16, %c0_17] : memref<4x1x32xf32, #tpu.memory_space<vmem>>, vector<1x1x32xf32>
    %17 = vector.shape_cast %16 : vector<1x1x32xf32> to vector<1x32xf32>
    %18 = tpu.concatenate %15, %17 in 1 : vector<1x32xf32>, vector<1x32xf32> -> vector<1x64xf32>
    %19 = tpu.iota {dimensions = array<i32: 1>} : vector<1x64xi32>
    %20 = arith.truncf %13 : vector<1x64xf32> to vector<1x64xbf16>
    %cst_18 = arith.constant dense<0.000000e+00> : vector<1x256xf32>
    %21 = tpu.matmul %20, %1, %cst_18 {dimension_numbers = #tpu.dot_dimension_numbers<[1], [0], [0], [1], [0, 0, 1, 1], [], []>} : vector<1x64xbf16>, vector<64x256xbf16>, vector<1x256xf32> -> vector<1x256xf32>
    %22 = vector.extract_strided_slice %8 {offsets = [0, 0], sizes = [1, 256], strides = [1, 1]} : vector<8x256xf32> to vector<1x256xf32>
    %23 = arith.addf %21, %22 : vector<1x256xf32>
    %24 = math.tanh %23 : vector<1x256xf32>
    %25 = vector.extract_strided_slice %24 {offsets = [0, 0], sizes = [1, 192], strides = [1, 1]} : vector<1x256xf32> to vector<1x192xf32>
    %cst_19 = arith.constant 5.000000e-01 : f32
    %26 = vector.broadcast %cst_19 : f32 to vector<1x192xf32>
    %27 = arith.mulf %26, %25 : vector<1x192xf32>
    %cst_20 = arith.constant 5.000000e-01 : f32
    %28 = vector.broadcast %cst_20 : f32 to vector<1x192xf32>
    %29 = arith.addf %27, %28 : vector<1x192xf32>
    %30 = vector.extract_strided_slice %29 {offsets = [0, 0], sizes = [1, 64], strides = [1, 1]} : vector<1x192xf32> to vector<1x64xf32>
    %31 = vector.extract_strided_slice %29 {offsets = [0, 64], sizes = [1, 64], strides = [1, 1]} : vector<1x192xf32> to vector<1x64xf32>
    %32 = vector.extract_strided_slice %29 {offsets = [0, 128], sizes = [1, 64], strides = [1, 1]} : vector<1x192xf32> to vector<1x64xf32>
    %33 = vector.extract_strided_slice %24 {offsets = [0, 192], sizes = [1, 64], strides = [1, 1]} : vector<1x256xf32> to vector<1x64xf32>
    %34 = arith.mulf %31, %18 : vector<1x64xf32>
    %35 = arith.mulf %30, %33 : vector<1x64xf32>
    %36 = arith.addf %34, %35 : vector<1x64xf32>
    %37 = math.tanh %36 : vector<1x64xf32>
    %38 = arith.mulf %32, %37 : vector<1x64xf32>
    %c0_i32 = arith.constant 0 : i32
    %39 = vector.broadcast %c0_i32 : i32 to vector<1x64xi32>
    %40 = arith.cmpi sge, %19, %39 : vector<1x64xi32>
    %c32_i32 = arith.constant 32 : i32
    %41 = vector.broadcast %c32_i32 : i32 to vector<1x64xi32>
    %42 = arith.cmpi slt, %19, %41 : vector<1x64xi32>
    %43 = arith.andi %40, %42 : vector<1x64xi1>
    %44 = arith.select %43, %38, %13 : vector<1x64xi1>, vector<1x64xf32>
    %45 = arith.select %43, %36, %18 : vector<1x64xi1>, vector<1x64xf32>
    %46 = arith.truncf %44 : vector<1x64xf32> to vector<1x64xbf16>
    %cst_21 = arith.constant dense<0.000000e+00> : vector<1x256xf32>
    %47 = tpu.matmul %46, %1, %cst_21 {dimension_numbers = #tpu.dot_dimension_numbers<[1], [0], [0], [1], [0, 0, 1, 1], [], []>} : vector<1x64xbf16>, vector<64x256xbf16>, vector<1x256xf32> -> vector<1x256xf32>
    %48 = vector.extract_strided_slice %8 {offsets = [1, 0], sizes = [1, 256], strides = [1, 1]} : vector<8x256xf32> to vector<1x256xf32>
    %49 = arith.addf %47, %48 : vector<1x256xf32>
    %50 = math.tanh %49 : vector<1x256xf32>
    %51 = vector.extract_strided_slice %50 {offsets = [0, 0], sizes = [1, 192], strides = [1, 1]} : vector<1x256xf32> to vector<1x192xf32>
    %cst_22 = arith.constant 5.000000e-01 : f32
    %52 = vector.broadcast %cst_22 : f32 to vector<1x192xf32>
    %53 = arith.mulf %52, %51 : vector<1x192xf32>
    %cst_23 = arith.constant 5.000000e-01 : f32
    %54 = vector.broadcast %cst_23 : f32 to vector<1x192xf32>
    %55 = arith.addf %53, %54 : vector<1x192xf32>
    %56 = vector.extract_strided_slice %55 {offsets = [0, 0], sizes = [1, 64], strides = [1, 1]} : vector<1x192xf32> to vector<1x64xf32>
    %57 = vector.extract_strided_slice %55 {offsets = [0, 64], sizes = [1, 64], strides = [1, 1]} : vector<1x192xf32> to vector<1x64xf32>
    %58 = vector.extract_strided_slice %55 {offsets = [0, 128], sizes = [1, 64], strides = [1, 1]} : vector<1x192xf32> to vector<1x64xf32>
    %59 = vector.extract_strided_slice %50 {offsets = [0, 192], sizes = [1, 64], strides = [1, 1]} : vector<1x256xf32> to vector<1x64xf32>
    %60 = arith.mulf %57, %45 : vector<1x64xf32>
    %61 = arith.mulf %56, %59 : vector<1x64xf32>
    %62 = arith.addf %60, %61 : vector<1x64xf32>
    %63 = math.tanh %62 : vector<1x64xf32>
    %64 = arith.mulf %58, %63 : vector<1x64xf32>
    %65 = arith.truncf %64 : vector<1x64xf32> to vector<1x64xbf16>
    %cst_24 = arith.constant dense<0.000000e+00> : vector<1x256xf32>
    %66 = tpu.matmul %65, %1, %cst_24 {dimension_numbers = #tpu.dot_dimension_numbers<[1], [0], [0], [1], [0, 0, 1, 1], [], []>} : vector<1x64xbf16>, vector<64x256xbf16>, vector<1x256xf32> -> vector<1x256xf32>
    %67 = vector.extract_strided_slice %8 {offsets = [2, 0], sizes = [1, 256], strides = [1, 1]} : vector<8x256xf32> to vector<1x256xf32>
    %68 = arith.addf %66, %67 : vector<1x256xf32>
    %69 = math.tanh %68 : vector<1x256xf32>
    %70 = vector.extract_strided_slice %69 {offsets = [0, 0], sizes = [1, 192], strides = [1, 1]} : vector<1x256xf32> to vector<1x192xf32>
    %cst_25 = arith.constant 5.000000e-01 : f32
    %71 = vector.broadcast %cst_25 : f32 to vector<1x192xf32>
    %72 = arith.mulf %71, %70 : vector<1x192xf32>
    %cst_26 = arith.constant 5.000000e-01 : f32
    %73 = vector.broadcast %cst_26 : f32 to vector<1x192xf32>
    %74 = arith.addf %72, %73 : vector<1x192xf32>
    %75 = vector.extract_strided_slice %74 {offsets = [0, 0], sizes = [1, 64], strides = [1, 1]} : vector<1x192xf32> to vector<1x64xf32>
    %76 = vector.extract_strided_slice %74 {offsets = [0, 64], sizes = [1, 64], strides = [1, 1]} : vector<1x192xf32> to vector<1x64xf32>
    %77 = vector.extract_strided_slice %74 {offsets = [0, 128], sizes = [1, 64], strides = [1, 1]} : vector<1x192xf32> to vector<1x64xf32>
    %78 = vector.extract_strided_slice %69 {offsets = [0, 192], sizes = [1, 64], strides = [1, 1]} : vector<1x256xf32> to vector<1x64xf32>
    %79 = arith.mulf %76, %62 : vector<1x64xf32>
    %80 = arith.mulf %75, %78 : vector<1x64xf32>
    %81 = arith.addf %79, %80 : vector<1x64xf32>
    %82 = math.tanh %81 : vector<1x64xf32>
    %83 = arith.mulf %77, %82 : vector<1x64xf32>
    %84 = arith.truncf %83 : vector<1x64xf32> to vector<1x64xbf16>
    %cst_27 = arith.constant dense<0.000000e+00> : vector<1x256xf32>
    %85 = tpu.matmul %84, %1, %cst_27 {dimension_numbers = #tpu.dot_dimension_numbers<[1], [0], [0], [1], [0, 0, 1, 1], [], []>} : vector<1x64xbf16>, vector<64x256xbf16>, vector<1x256xf32> -> vector<1x256xf32>
    %86 = vector.extract_strided_slice %8 {offsets = [3, 0], sizes = [1, 256], strides = [1, 1]} : vector<8x256xf32> to vector<1x256xf32>
    %87 = arith.addf %85, %86 : vector<1x256xf32>
    %88 = math.tanh %87 : vector<1x256xf32>
    %89 = vector.extract_strided_slice %88 {offsets = [0, 0], sizes = [1, 192], strides = [1, 1]} : vector<1x256xf32> to vector<1x192xf32>
    %cst_28 = arith.constant 5.000000e-01 : f32
    %90 = vector.broadcast %cst_28 : f32 to vector<1x192xf32>
    %91 = arith.mulf %90, %89 : vector<1x192xf32>
    %cst_29 = arith.constant 5.000000e-01 : f32
    %92 = vector.broadcast %cst_29 : f32 to vector<1x192xf32>
    %93 = arith.addf %91, %92 : vector<1x192xf32>
    %94 = vector.extract_strided_slice %93 {offsets = [0, 0], sizes = [1, 64], strides = [1, 1]} : vector<1x192xf32> to vector<1x64xf32>
    %95 = vector.extract_strided_slice %93 {offsets = [0, 64], sizes = [1, 64], strides = [1, 1]} : vector<1x192xf32> to vector<1x64xf32>
    %96 = vector.extract_strided_slice %93 {offsets = [0, 128], sizes = [1, 64], strides = [1, 1]} : vector<1x192xf32> to vector<1x64xf32>
    %97 = vector.extract_strided_slice %88 {offsets = [0, 192], sizes = [1, 64], strides = [1, 1]} : vector<1x256xf32> to vector<1x64xf32>
    %98 = arith.mulf %95, %81 : vector<1x64xf32>
    %99 = arith.mulf %94, %97 : vector<1x64xf32>
    %100 = arith.addf %98, %99 : vector<1x64xf32>
    %101 = math.tanh %100 : vector<1x64xf32>
    %102 = arith.mulf %96, %101 : vector<1x64xf32>
    %103 = arith.truncf %102 : vector<1x64xf32> to vector<1x64xbf16>
    %cst_30 = arith.constant dense<0.000000e+00> : vector<1x256xf32>
    %104 = tpu.matmul %103, %1, %cst_30 {dimension_numbers = #tpu.dot_dimension_numbers<[1], [0], [0], [1], [0, 0, 1, 1], [], []>} : vector<1x64xbf16>, vector<64x256xbf16>, vector<1x256xf32> -> vector<1x256xf32>
    %105 = vector.extract_strided_slice %8 {offsets = [4, 0], sizes = [1, 256], strides = [1, 1]} : vector<8x256xf32> to vector<1x256xf32>
    %106 = arith.addf %104, %105 : vector<1x256xf32>
    %107 = math.tanh %106 : vector<1x256xf32>
    %108 = vector.extract_strided_slice %107 {offsets = [0, 0], sizes = [1, 192], strides = [1, 1]} : vector<1x256xf32> to vector<1x192xf32>
    %cst_31 = arith.constant 5.000000e-01 : f32
    %109 = vector.broadcast %cst_31 : f32 to vector<1x192xf32>
    %110 = arith.mulf %109, %108 : vector<1x192xf32>
    %cst_32 = arith.constant 5.000000e-01 : f32
    %111 = vector.broadcast %cst_32 : f32 to vector<1x192xf32>
    %112 = arith.addf %110, %111 : vector<1x192xf32>
    %113 = vector.extract_strided_slice %112 {offsets = [0, 0], sizes = [1, 64], strides = [1, 1]} : vector<1x192xf32> to vector<1x64xf32>
    %114 = vector.extract_strided_slice %112 {offsets = [0, 64], sizes = [1, 64], strides = [1, 1]} : vector<1x192xf32> to vector<1x64xf32>
    %115 = vector.extract_strided_slice %112 {offsets = [0, 128], sizes = [1, 64], strides = [1, 1]} : vector<1x192xf32> to vector<1x64xf32>
    %116 = vector.extract_strided_slice %107 {offsets = [0, 192], sizes = [1, 64], strides = [1, 1]} : vector<1x256xf32> to vector<1x64xf32>
    %117 = arith.mulf %114, %100 : vector<1x64xf32>
    %118 = arith.mulf %113, %116 : vector<1x64xf32>
    %119 = arith.addf %117, %118 : vector<1x64xf32>
    %120 = math.tanh %119 : vector<1x64xf32>
    %121 = arith.mulf %115, %120 : vector<1x64xf32>
    %122 = arith.truncf %121 : vector<1x64xf32> to vector<1x64xbf16>
    %cst_33 = arith.constant dense<0.000000e+00> : vector<1x256xf32>
    %123 = tpu.matmul %122, %1, %cst_33 {dimension_numbers = #tpu.dot_dimension_numbers<[1], [0], [0], [1], [0, 0, 1, 1], [], []>} : vector<1x64xbf16>, vector<64x256xbf16>, vector<1x256xf32> -> vector<1x256xf32>
    %124 = vector.extract_strided_slice %8 {offsets = [5, 0], sizes = [1, 256], strides = [1, 1]} : vector<8x256xf32> to vector<1x256xf32>
    %125 = arith.addf %123, %124 : vector<1x256xf32>
    %126 = math.tanh %125 : vector<1x256xf32>
    %127 = vector.extract_strided_slice %126 {offsets = [0, 0], sizes = [1, 192], strides = [1, 1]} : vector<1x256xf32> to vector<1x192xf32>
    %cst_34 = arith.constant 5.000000e-01 : f32
    %128 = vector.broadcast %cst_34 : f32 to vector<1x192xf32>
    %129 = arith.mulf %128, %127 : vector<1x192xf32>
    %cst_35 = arith.constant 5.000000e-01 : f32
    %130 = vector.broadcast %cst_35 : f32 to vector<1x192xf32>
    %131 = arith.addf %129, %130 : vector<1x192xf32>
    %132 = vector.extract_strided_slice %131 {offsets = [0, 0], sizes = [1, 64], strides = [1, 1]} : vector<1x192xf32> to vector<1x64xf32>
    %133 = vector.extract_strided_slice %131 {offsets = [0, 64], sizes = [1, 64], strides = [1, 1]} : vector<1x192xf32> to vector<1x64xf32>
    %134 = vector.extract_strided_slice %131 {offsets = [0, 128], sizes = [1, 64], strides = [1, 1]} : vector<1x192xf32> to vector<1x64xf32>
    %135 = vector.extract_strided_slice %126 {offsets = [0, 192], sizes = [1, 64], strides = [1, 1]} : vector<1x256xf32> to vector<1x64xf32>
    %136 = arith.mulf %133, %119 : vector<1x64xf32>
    %137 = arith.mulf %132, %135 : vector<1x64xf32>
    %138 = arith.addf %136, %137 : vector<1x64xf32>
    %139 = math.tanh %138 : vector<1x64xf32>
    %140 = arith.mulf %134, %139 : vector<1x64xf32>
    %141 = arith.truncf %140 : vector<1x64xf32> to vector<1x64xbf16>
    %cst_36 = arith.constant dense<0.000000e+00> : vector<1x256xf32>
    %142 = tpu.matmul %141, %1, %cst_36 {dimension_numbers = #tpu.dot_dimension_numbers<[1], [0], [0], [1], [0, 0, 1, 1], [], []>} : vector<1x64xbf16>, vector<64x256xbf16>, vector<1x256xf32> -> vector<1x256xf32>
    %143 = vector.extract_strided_slice %8 {offsets = [6, 0], sizes = [1, 256], strides = [1, 1]} : vector<8x256xf32> to vector<1x256xf32>
    %144 = arith.addf %142, %143 : vector<1x256xf32>
    %145 = math.tanh %144 : vector<1x256xf32>
    %146 = vector.extract_strided_slice %145 {offsets = [0, 0], sizes = [1, 192], strides = [1, 1]} : vector<1x256xf32> to vector<1x192xf32>
    %cst_37 = arith.constant 5.000000e-01 : f32
    %147 = vector.broadcast %cst_37 : f32 to vector<1x192xf32>
    %148 = arith.mulf %147, %146 : vector<1x192xf32>
    %cst_38 = arith.constant 5.000000e-01 : f32
    %149 = vector.broadcast %cst_38 : f32 to vector<1x192xf32>
    %150 = arith.addf %148, %149 : vector<1x192xf32>
    %151 = vector.extract_strided_slice %150 {offsets = [0, 0], sizes = [1, 64], strides = [1, 1]} : vector<1x192xf32> to vector<1x64xf32>
    %152 = vector.extract_strided_slice %150 {offsets = [0, 64], sizes = [1, 64], strides = [1, 1]} : vector<1x192xf32> to vector<1x64xf32>
    %153 = vector.extract_strided_slice %150 {offsets = [0, 128], sizes = [1, 64], strides = [1, 1]} : vector<1x192xf32> to vector<1x64xf32>
    %154 = vector.extract_strided_slice %145 {offsets = [0, 192], sizes = [1, 64], strides = [1, 1]} : vector<1x256xf32> to vector<1x64xf32>
    %155 = arith.mulf %152, %138 : vector<1x64xf32>
    %156 = arith.mulf %151, %154 : vector<1x64xf32>
    %157 = arith.addf %155, %156 : vector<1x64xf32>
    %158 = math.tanh %157 : vector<1x64xf32>
    %159 = arith.mulf %153, %158 : vector<1x64xf32>
    %160 = arith.truncf %159 : vector<1x64xf32> to vector<1x64xbf16>
    %cst_39 = arith.constant dense<0.000000e+00> : vector<1x256xf32>
    %161 = tpu.matmul %160, %1, %cst_39 {dimension_numbers = #tpu.dot_dimension_numbers<[1], [0], [0], [1], [0, 0, 1, 1], [], []>} : vector<1x64xbf16>, vector<64x256xbf16>, vector<1x256xf32> -> vector<1x256xf32>
    %162 = vector.extract_strided_slice %8 {offsets = [7, 0], sizes = [1, 256], strides = [1, 1]} : vector<8x256xf32> to vector<1x256xf32>
    %163 = arith.addf %161, %162 : vector<1x256xf32>
    %164 = math.tanh %163 : vector<1x256xf32>
    %165 = vector.extract_strided_slice %164 {offsets = [0, 0], sizes = [1, 192], strides = [1, 1]} : vector<1x256xf32> to vector<1x192xf32>
    %cst_40 = arith.constant 5.000000e-01 : f32
    %166 = vector.broadcast %cst_40 : f32 to vector<1x192xf32>
    %167 = arith.mulf %166, %165 : vector<1x192xf32>
    %cst_41 = arith.constant 5.000000e-01 : f32
    %168 = vector.broadcast %cst_41 : f32 to vector<1x192xf32>
    %169 = arith.addf %167, %168 : vector<1x192xf32>
    %170 = vector.extract_strided_slice %169 {offsets = [0, 0], sizes = [1, 64], strides = [1, 1]} : vector<1x192xf32> to vector<1x64xf32>
    %171 = vector.extract_strided_slice %169 {offsets = [0, 64], sizes = [1, 64], strides = [1, 1]} : vector<1x192xf32> to vector<1x64xf32>
    %172 = vector.extract_strided_slice %169 {offsets = [0, 128], sizes = [1, 64], strides = [1, 1]} : vector<1x192xf32> to vector<1x64xf32>
    %173 = vector.extract_strided_slice %164 {offsets = [0, 192], sizes = [1, 64], strides = [1, 1]} : vector<1x256xf32> to vector<1x64xf32>
    %174 = arith.mulf %171, %157 : vector<1x64xf32>
    %175 = arith.mulf %170, %173 : vector<1x64xf32>
    %176 = arith.addf %174, %175 : vector<1x64xf32>
    %177 = math.tanh %176 : vector<1x64xf32>
    %178 = arith.mulf %172, %177 : vector<1x64xf32>
    %179 = arith.truncf %178 : vector<1x64xf32> to vector<1x64xbf16>
    %cst_42 = arith.constant dense<0.000000e+00> : vector<1x256xf32>
    %180 = tpu.matmul %179, %1, %cst_42 {dimension_numbers = #tpu.dot_dimension_numbers<[1], [0], [0], [1], [0, 0, 1, 1], [], []>} : vector<1x64xbf16>, vector<64x256xbf16>, vector<1x256xf32> -> vector<1x256xf32>
    %181 = arith.addf %180, %2 : vector<1x256xf32>
    %182 = math.tanh %181 : vector<1x256xf32>
    %183 = vector.extract_strided_slice %182 {offsets = [0, 0], sizes = [1, 192], strides = [1, 1]} : vector<1x256xf32> to vector<1x192xf32>
    %cst_43 = arith.constant 5.000000e-01 : f32
    %184 = vector.broadcast %cst_43 : f32 to vector<1x192xf32>
    %185 = arith.mulf %184, %183 : vector<1x192xf32>
    %cst_44 = arith.constant 5.000000e-01 : f32
    %186 = vector.broadcast %cst_44 : f32 to vector<1x192xf32>
    %187 = arith.addf %185, %186 : vector<1x192xf32>
    %188 = vector.extract_strided_slice %187 {offsets = [0, 0], sizes = [1, 64], strides = [1, 1]} : vector<1x192xf32> to vector<1x64xf32>
    %189 = vector.extract_strided_slice %187 {offsets = [0, 64], sizes = [1, 64], strides = [1, 1]} : vector<1x192xf32> to vector<1x64xf32>
    %190 = vector.extract_strided_slice %187 {offsets = [0, 128], sizes = [1, 64], strides = [1, 1]} : vector<1x192xf32> to vector<1x64xf32>
    %191 = vector.extract_strided_slice %182 {offsets = [0, 192], sizes = [1, 64], strides = [1, 1]} : vector<1x256xf32> to vector<1x64xf32>
    %192 = arith.mulf %189, %176 : vector<1x64xf32>
    %193 = arith.mulf %188, %191 : vector<1x64xf32>
    %194 = arith.addf %192, %193 : vector<1x64xf32>
    %195 = math.tanh %194 : vector<1x64xf32>
    %196 = arith.mulf %190, %195 : vector<1x64xf32>
    %c32_i32_45 = arith.constant 32 : i32
    %197 = vector.broadcast %c32_i32_45 : i32 to vector<1x64xi32>
    %198 = arith.cmpi sge, %19, %197 : vector<1x64xi32>
    %c64_i32 = arith.constant 64 : i32
    %199 = vector.broadcast %c64_i32 : i32 to vector<1x64xi32>
    %200 = arith.cmpi slt, %19, %199 : vector<1x64xi32>
    %201 = arith.andi %198, %200 : vector<1x64xi1>
    %202 = arith.select %201, %196, %178 : vector<1x64xi1>, vector<1x64xf32>
    %203 = vector.extract_strided_slice %202 {offsets = [0, 32], sizes = [1, 32], strides = [1, 1]} : vector<1x64xf32> to vector<1x32xf32>
    %cst_46 = arith.constant 0.000000e+00 : f32
    %204 = vector.broadcast %cst_46 : f32 to vector<1x32xf32>
    %205 = arith.cmpf ogt, %203, %204 : vector<1x32xf32>
    %cst_47 = arith.constant 0.00999999977 : f32
    %206 = vector.broadcast %cst_47 : f32 to vector<1x32xf32>
    %207 = arith.mulf %206, %203 : vector<1x32xf32>
    %208 = arith.select %205, %203, %207 : vector<1x32xi1>, vector<1x32xf32>
    %209 = arith.mulf %208, %3 : vector<1x32xf32>
    %cst_48 = arith.constant dense<0.000000e+00> : vector<1xf32>
    %210 = vector.multi_reduction <add>, %209, %cst_48 [1] : vector<1x32xf32> to vector<1xf32>
    %211 = vector.shape_cast %210 : vector<1xf32> to vector<1x1xf32>
    %212 = arith.addf %211, %4 : vector<1x1xf32>
    %c0_49 = arith.constant 0 : index
    %c0_50 = arith.constant 0 : index
    %213 = vector.load %arg4[%c0_49, %c0_50] : memref<1x1xf32, #tpu.memory_space<vmem>>, vector<1x1xf32>
    tpu.vector_store %arg4[%c0_49, %c0_50], %212 {strides = array<i32>} : memref<1x1xf32, #tpu.memory_space<vmem>>, vector<1x1xf32>,
    return
  }
}

</mosaic_0001>

<bundles_post_ra>
// kernel: bias_correction_rnn_forward.1
= control target key start
LH: loop header
LB: loop body
LE: loop exit
PB: predicated region body
PF: predicated region fallthrough
CT: control target
= control target key end

     0   :  { %9 = vsyncpa [#allocation3], 0  ;;  %s1294_s0 = inlined_call_operand.vmem [shape: bf16[8,16], index: 0, kind: input, shape index: {}]   ;;  %s1295_s1 = inlined_call_operand.hbm [shape: bf16[80,256], index: 1, kind: input, shape index: {}]   ;;  %s1296_s2 = inlined_call_operand.vmem [shape: f32[2,256], index: 2, kind: input, shape index: {}]   ;;  %s1297_s3 = inlined_call_operand.vmem [shape: f32[4,1,32], index: 3, kind: input, shape index: {}]   ;;  %s1298_s4 = inlined_call_operand.hbm [shape: f32[1,1], index: 4, kind: output, shape index: {}]  }
   0x1   :  { %10 = vsyncpa [#allocation4], 0  ;;  %s1036_s15 = smov [#allocation2]   ;;  %s988_s19 = scalar_lea.hbm %s1295_s1, 1280 }
   0x2   :  { %s18_s16 = sshll.u32 %s1036_s15, 4  ;;  %p989_p0 = scmp.ne.s32.totalorder %s1295_s1, %s988_s19  ;;  %s19_s16 = int_to_ptr.vmem [resolvable:$true] %s18_s16 }
   0x3   :  { %p992_p1 = scmp.lt.u32.totalorder %s988_s19, %s1295_s1 }
   0x5   :  { %p994_p2 = pnand %p992_p1, %p989_p0 }
   0x7   :  { %997 = shalt.err (!%p994_p2)
}
   0x8   :  { %s998_s24 = scalar_lea.vmem %s19_s16, 1280  ;;  %p1003_p4 = scmp.lt.s32.totalorder %s19_s16, %s19_s16 }
   0x9   :  { %p999_p3 = scmp.ne.s32.totalorder %s19_s16, %s998_s24  ;;  %p1004_p5 = scmp.lt.s32.totalorder %s998_s24, %s998_s24 }
   0xb   :  { %p1005_p6 = por %p1004_p5, %p1003_p4 }
   0xd   :  { %p1006_p7 = pnand %p1005_p6, %p999_p3 }
   0xf   :  { %1009 = shalt.err (!%p1006_p7)
}
  0x10   :  { %s1037_s25 = smov 128   ;;  %s1038_s26 = smov 8  }
  0x11   :  { %24 = dma.hbm_to_vmem [thread:$0]  %s1295_s1, 1280, %s19_s16, [#allocation3], %s1037_s25, %s1037_s25, %s1038_s26  }
  0x12   :  { %1032 = dma.done.wait [#allocation3], 1280  }
  0x13   :  { %1033 = vsyncadd [#allocation3], 4294966016  ;;  %v1039_v0 = vmov 0   ;;  %v889_v1 = vld [vmem:[%s1297_s3 + $0x1] ss:$0 sm:$0xff]  ;;  %s1040_s5 = smov 32   ;;  %v47_v22 = vlaneseq }
  0x14   :  { %103 = vmatprep.mubr.bf16.mxu0 %v1039_v0  ;;  %217 = vmatprep.mubr.bf16.mxu1 %v1039_v0  ;;  %v1087_v2 = vld [vmem:[#allocation2 + $0x14] ss:$8 sps:$4 sm:$0xff]   ;;  %v1089_v3 = vld [vmem:[#allocation2 + $0x10] ss:$8 sps:$4 sm:$0xff]   ;;  %v1091_v4 = vld [vmem:[#allocation2 + $0x24] ss:$8 sps:$4 sm:$0xff]  }
  0x15   :  { %120 = vrot.lane.b32.xlu0 %v889_v1, %s1040_s5  ;;  %v1093_v5 = vld [vmem:[#allocation2 + $0x20] ss:$8 sps:$4 sm:$0xff]   ;;  %185 = vmatprep.subr.bf16.mxu1 %v1087_v2  ;;  %v925_v6 = vld [vmem:[#allocation2 + $0x4] ss:$8 sps:$4 sm:$0xff]   ;;  %v1098_v8 = vld [vmem:[#allocation2 + $0x34] ss:$8 sps:$4 sm:$0xff]  }
  0x16   :  { %186 = vmatpush1.bf16.msra.mxu1 %v1089_v3  ;;  %v927_v7 = vld [vmem:[#allocation2] ss:$8 sps:$4 sm:$0xff]   ;;  %71 = vmatprep.subr.bf16.mxu0 %v925_v6  ;;  %vm67_vm0 = vcmask 130048   ;;  %v1108_v11 = vld [vmem:[#allocation2 + $0x30] ss:$8 sps:$4 sm:$0xff]   ;;  %vm123_vm1 = vcmask 261120  }
  0x17   :  { %187 = vmatprep.subr.bf16.mxu1 %v1091_v4  ;;  %72 = vmatpush1.bf16.msra.mxu0 %v927_v7  ;;  %v45_v9 = vld [vmem:[%s1294_s0] sm:$0xf]  ;;  %v1112_v12 = vld [vmem:[#allocation2 + $0x44] ss:$8 sps:$4 sm:$0xff]   ;;  %vm181_vm2 = vcmask 523264   ;;  %v48_v23 = vshrl.u32 %v47_v22, 7 }
  0x18   :  { %v892_v10 = vld [vmem:[%s1297_s3 + $0x3] ss:$0 sm:$0xff]  ;;  %272 = vmatprep.subr.bf16.mxu0 %v1087_v2  ;;  %v112_v14 = vld [vmem:[%s1297_s3] sm:$0x1]  ;;  %v890_v34 = vld [vmem:[%s1297_s3 + $0x2] sm:$0x1] }
  0x19   :  { %134 = vrot.lane.b32.xlu0 %v892_v10, %s1040_s5  ;;  %v1118_v13 = vld [vmem:[#allocation2 + $0x40] ss:$8 sps:$4 sm:$0xff]   ;;  %v53_v24 = vsub.s32 1, %v48_v23  ;;  %s1041_s14 = smov 64   ;;  %v49_v37 = vsub.s32 0, %v48_v23  ;;  %v1171_v51 = vand.u32 127, %v47_v22 }
  0x1a   :  { %188 = vmatpush1.bf16.msra.mxu1 %v1093_v5  ;;  %887 = vmatmul.mubr.msk.bf16.vlgmr.msra.gmra.mrb[0].mxu0 %vm67_vm0, %v45_v9  ;;  %v43_v25 = vld [vmem:[%s1296_s2] ss:$2 sm:$0x3]  ;;  %vm860_vm8 = vcmask 253952   ;;  %s1043_s16 = smov [#allocation5]   ;;  %vm868_vm9 = vcmask 0  }
  0x1b   :  { %189 = vmatprep.subr.bf16.mxu1 %v1098_v8  ;;  %273 = vmatpush1.bf16.msra.mxu0 %v1089_v3  ;;  %v1150_v26 = vrot.slane %v43_v25, %v53_v24  ;;  %v1162_v38 = vrot.slane %v43_v25, %v49_v37  ;;  %vm254_vm3 = vcmp.lt.s32.totalorder %v1171_v51, 32  ;;  %vm840_vm4 = vcmp.ge.s32.totalorder %v1171_v51, 32  ;;  %s876_s17 = sshll.u32 %s1043_s16, 4  ;;  %s877_s17 = int_to_ptr.vmem [resolvable:$true] %s876_s17 }
  0x1c   :  { %304 = vmatprep.mubr.bf16.mxu0 %v1039_v0  ;;  %274 = vmatprep.subr.bf16.mxu0 %v1091_v4  ;;  %vm841_vm5 = vcmp.lt.s32.totalorder %v1171_v51, 64  ;;  %s1010_s18 = scalar_lea.vmem %s877_s17, 16  ;;  %s1014_s19 = scalar_lea.vmem %s877_s17, 32 }
  0x1d   :  { %vm842_vm6 = vmand %vm840_vm4, %vm841_vm5  ;;  %p1011_p8 = scmp.ne.s32.totalorder %s877_s17, %s1010_s18  ;;  %p1015_p9 = scmp.lt.s32.totalorder %s877_s17, %s877_s17 }
  0x1e   :  { %190 = vmatpush1.bf16.msra.mxu1 %v1108_v11  ;;  %p1016_p10 = scmp.lt.s32.totalorder %s1014_s19, %s1010_s18 }
  0x1f   :  { %191 = vmatprep.subr.bf16.mxu1 %v1112_v12  ;;  %275 = vmatpush1.bf16.msra.mxu0 %v1093_v5 }
  0x20   :  { %276 = vmatprep.subr.bf16.mxu0 %v1098_v8  ;;  %p1017_p11 = por %p1016_p10, %p1015_p9 }
  0x22   :  { %192 = vmatpush1.bf16.msra.mxu1 %v1118_v13  ;;  %p1018_p12 = pnand %p1017_p11, %p1011_p8 }
  0x23   :  { %348 = vmatprep.subr.bf16.mxu1 %v1087_v2  ;;  %277 = vmatpush1.bf16.msra.mxu0 %v1108_v11 }
  0x24   :  { %278 = vmatprep.subr.bf16.mxu0 %v1112_v12 }
  0x27   :  { %279 = vmatpush1.bf16.msra.mxu0 %v1118_v13 }
  0x28   :  { %420 = vmatprep.subr.bf16.mxu0 %v1087_v2 }
  0x87   :  { %v121_v15 = vpop.permute.xlu0 %120 }
  0x88   :  { %v1133_v16 = vsel %vm123_vm1, %v112_v14, %v121_v15 }
  0x89   :  { %v140_v17 = vpack.c.bf16 %v1133_v16, %v1133_v16 }
  0x8b   :  { %901 = vmatmul.mubr.msk.bf16.vlgmr.msra.gmra.mrb[0].mxu1 %vm181_vm2, %v140_v17  ;;  %v135_v33 = vpop.permute.xlu0 %134 }
  0x8c   :  { %349 = vmatpush1.bf16.msra.mxu1 %v1089_v3  ;;  %380 = vmatprep.mubr.bf16.mxu1 %v1039_v0  ;;  %v137_v36 = vsel %vm123_vm1, %v890_v34, %v135_v33 }
  0x8d   :  { %350 = vmatprep.subr.bf16.mxu1 %v1091_v4 }
  0x90   :  { %351 = vmatpush1.bf16.msra.mxu1 %v1093_v5 }
  0x91   :  { %352 = vmatprep.subr.bf16.mxu1 %v1098_v8 }
  0x94   :  { %353 = vmatpush1.bf16.msra.mxu1 %v1108_v11 }
  0x95   :  { %354 = vmatprep.subr.bf16.mxu1 %v1112_v12 }
  0x98   :  { %355 = vmatpush1.bf16.msra.mxu1 %v1118_v13 }
  0x99   :  { %492 = vmatprep.subr.bf16.mxu1 %v1087_v2 }
  0xed   :  { %v105_v18 = vpop.f32.mrb[0].mxu0 }
  0xee   :  { %v107_v19 = vpop.f32.mrb[1].mxu0  ;;  %v1165_v39 = vadd.f32 %v105_v18, %v1162_v38 }
  0xef   :  { %v109_v20 = vpop.f32.mrb[2].mxu0  ;;  %v1153_v27 = vadd.f32 %v107_v19, %v1150_v26 }
  0xf0   :  { %v110_v21 = vpop.f32.mrb[3].mxu0  ;;  %v265_v9 = vrot.slane %v1165_v39, 1 }
  0xf1   :  { %v266_v61 = vrot.slane %v1153_v27, 1 }
 0x15e   :  { %v219_v28 = vpop.f32.mrb[0].mxu1 }
 0x15f   :  { %v221_v29 = vpop.f32.mrb[1].mxu1  ;;  %v220_v40 = vadd.f32 %v219_v28, %v1165_v39 }
 0x160   :  { %v222_v30 = vadd.f32 %v221_v29, %v1153_v27  ;;  %v223_v31 = vpop.f32.mrb[2].mxu1 }
 0x161   :  { %v224_v32 = vpop.f32.mrb[3].mxu1 }
 0x162   :  { %934 = vtanh.f32 %v222_v30  ;;  %v342_v32 = vrot.slane %v1153_v27, 2 }
 0x163   :  { %936 = vtanh.f32 %v220_v40  ;;  %v341_v40 = vrot.slane %v1165_v39, 2 }
 0x16c   :  { %v935_v35 = vpop.eup %934 }
 0x16d   :  { %238 = vrot.lane.b32.xlu1 %v935_v35, %s1041_s14  ;;  %v937_v41 = vpop.eup %936  ;;  %v229_v54 = vmul.f32 0.5, %v935_v35 }
 0x16e   :  { %v228_v42 = vmul.f32 0.5, %v937_v41 }
 0x16f   :  { %v231_v55 = vadd.f32 0.5, %v229_v54 }
 0x170   :  { %v230_v43 = vadd.f32 0.5, %v228_v42 }
 0x171   :  { %233 = vrot.lane.b32.xlu1 %v137_v36, %s1041_s14 }
 0x1df   :  { %v239_v44 = vpop.permute.xlu1 %238 }
 0x1e0   :  { %v241_v45 = vmul.f32 %v239_v44, %v230_v43 }
 0x1e2   :  { %243 = vrot.lane.b32.xlu0 %v241_v45, %s1041_s14 }
 0x1e3   :  { %v234_v46 = vpop.permute.xlu1 %233 }
 0x1e4   :  { %v236_v47 = vmul.f32 %v234_v46, %v230_v43 }
 0x254   :  { %v244_v48 = vpop.permute.xlu0 %243 }
 0x255   :  { %v246_v49 = vadd.f32 %v244_v48, %v236_v47 }
 0x257   :  { %938 = vtanh.f32 %v246_v49  ;;  %258 = vrot.lane.b32.xlu0 %v246_v49, %s1041_s14 }
 0x261   :  { %v939_v50 = vpop.eup %938 }
 0x262   :  { %249 = vrot.lane.b32.xlu1 %v939_v50, %s1041_s14 }
 0x2c9   :  { %v259_v52 = vpop.permute.xlu0 %258 }
 0x2ca   :  { %v261_v53 = vsel %vm254_vm3, %v259_v52, %v137_v36 }
 0x2cb   :  { %320 = vrot.lane.b32.xlu0 %v261_v53, %s1041_s14 }
 0x2d4   :  { %v250_v56 = vpop.permute.xlu1 %249 }
 0x2d5   :  { %v252_v57 = vmul.f32 %v250_v56, %v231_v55 }
 0x2d7   :  { %v256_v58 = vsel %vm254_vm3, %v252_v57, %v1133_v16 }
 0x2d8   :  { %v262_v59 = vpack.c.bf16 %v256_v58, %v256_v58  ;;  %v414_v58 = vrot.slane %v1153_v27, 3 }
 0x2da   :  { %902 = vmatmul.mubr.msk.bf16.vlgmr.msra.gmra.mrb[4].mxu0 %vm181_vm2, %v262_v59 }
 0x2db   :  { %421 = vmatpush1.bf16.msra.mxu0 %v1089_v3  ;;  %452 = vmatprep.mubr.bf16.mxu0 %v1039_v0 }
 0x2dc   :  { %422 = vmatprep.subr.bf16.mxu0 %v1091_v4 }
 0x2df   :  { %423 = vmatpush1.bf16.msra.mxu0 %v1093_v5 }
 0x2e0   :  { %424 = vmatprep.subr.bf16.mxu0 %v1098_v8 }
 0x2e3   :  { %425 = vmatpush1.bf16.msra.mxu0 %v1108_v11 }
 0x2e4   :  { %426 = vmatprep.subr.bf16.mxu0 %v1112_v12 }
 0x2e7   :  { %427 = vmatpush1.bf16.msra.mxu0 %v1118_v13 }
 0x2e8   :  { %564 = vmatprep.subr.bf16.mxu0 %v1087_v2 }
 0x33d   :  { %v321_v19 = vpop.permute.xlu0 %320 }
 0x3ad   :  { %v306_v60 = vpop.f32.mrb[4].mxu0 }
 0x3ae   :  { %v308_v62 = vpop.f32.mrb[5].mxu0  ;;  %v307_v10 = vadd.f32 %v306_v60, %v265_v9 }
 0x3af   :  { %v309_v63 = vadd.f32 %v308_v62, %v266_v61  ;;  %v310_v1 = vpop.f32.mrb[6].mxu0 }
 0x3b0   :  { %v311_v6 = vpop.f32.mrb[7].mxu0  ;;  %v413_v1 = vrot.slane %v1165_v39, 3 }
 0x3b1   :  { %940 = vtanh.f32 %v309_v63 }
 0x3b2   :  { %942 = vtanh.f32 %v307_v10 }
 0x3bb   :  { %v941_v7 = vpop.eup %940 }
 0x3bc   :  { %325 = vrot.lane.b32.xlu1 %v941_v7, %s1041_s14  ;;  %v943_v14 = vpop.eup %942  ;;  %v316_v24 = vmul.f32 0.5, %v941_v7 }
 0x3bd   :  { %v315_v15 = vmul.f32 0.5, %v943_v14 }
 0x3be   :  { %v318_v25 = vadd.f32 0.5, %v316_v24 }
 0x3bf   :  { %v317_v16 = vadd.f32 0.5, %v315_v15 }
 0x3c1   :  { %v323_v20 = vmul.f32 %v321_v19, %v317_v16 }
 0x42e   :  { %v326_v17 = vpop.permute.xlu1 %325 }
 0x42f   :  { %v328_v18 = vmul.f32 %v326_v17, %v317_v16 }
 0x431   :  { %330 = vrot.lane.b32.xlu1 %v328_v18, %s1041_s14 }
 0x4a3   :  { %v331_v21 = vpop.permute.xlu1 %330 }
 0x4a4   :  { %v333_v22 = vadd.f32 %v331_v21, %v323_v20 }
 0x4a6   :  { %944 = vtanh.f32 %v333_v22 }
 0x4b0   :  { %v945_v23 = vpop.eup %944 }
 0x4b1   :  { %336 = vrot.lane.b32.xlu0 %v945_v23, %s1041_s14 }
 0x523   :  { %v337_v28 = vpop.permute.xlu0 %336 }
 0x524   :  { %v339_v29 = vmul.f32 %v337_v28, %v318_v25  ;;  %v486_v28 = vrot.slane %v1153_v27, 4 }
 0x526   :  { %v340_v30 = vpack.c.bf16 %v339_v29, %v339_v29 }
 0x528   :  { %903 = vmatmul.mubr.msk.bf16.vlgmr.msra.gmra.mrb[4].mxu1 %vm181_vm2, %v340_v30 }
 0x529   :  { %493 = vmatpush1.bf16.msra.mxu1 %v1089_v3  ;;  %524 = vmatprep.mubr.bf16.mxu1 %v1039_v0 }
 0x52a   :  { %494 = vmatprep.subr.bf16.mxu1 %v1091_v4 }
 0x52d   :  { %495 = vmatpush1.bf16.msra.mxu1 %v1093_v5 }
 0x52e   :  { %496 = vmatprep.subr.bf16.mxu1 %v1098_v8 }
 0x531   :  { %497 = vmatpush1.bf16.msra.mxu1 %v1108_v11 }
 0x532   :  { %498 = vmatprep.subr.bf16.mxu1 %v1112_v12 }
 0x535   :  { %499 = vmatpush1.bf16.msra.mxu1 %v1118_v13 }
 0x536   :  { %636 = vmatprep.subr.bf16.mxu1 %v1087_v2 }
 0x5fb   :  { %v382_v31 = vpop.f32.mrb[4].mxu1 }
 0x5fc   :  { %v384_v33 = vpop.f32.mrb[5].mxu1  ;;  %v383_v41 = vadd.f32 %v382_v31, %v341_v40 }
 0x5fd   :  { %v385_v34 = vadd.f32 %v384_v33, %v342_v32  ;;  %v386_v35 = vpop.f32.mrb[6].mxu1 }
 0x5fe   :  { %v387_v36 = vpop.f32.mrb[7].mxu1 }
 0x5ff   :  { %946 = vtanh.f32 %v385_v34  ;;  %v485_v34 = vrot.slane %v1165_v39, 4 }
 0x600   :  { %948 = vtanh.f32 %v383_v41 }
 0x609   :  { %v947_v37 = vpop.eup %946 }
 0x60a   :  { %397 = vrot.lane.b32.xlu1 %v947_v37, %s1041_s14  ;;  %v949_v42 = vpop.eup %948  ;;  %v392_v52 = vmul.f32 0.5, %v947_v37 }
 0x60b   :  { %v391_v43 = vmul.f32 0.5, %v949_v42 }
 0x60c   :  { %v394_v53 = vadd.f32 0.5, %v392_v52 }
 0x60d   :  { %v393_v44 = vadd.f32 0.5, %v391_v43 }
 0x60f   :  { %v395_v47 = vmul.f32 %v393_v44, %v333_v22 }
 0x67c   :  { %v398_v45 = vpop.permute.xlu1 %397 }
 0x67d   :  { %v400_v46 = vmul.f32 %v398_v45, %v393_v44 }
 0x67f   :  { %402 = vrot.lane.b32.xlu0 %v400_v46, %s1041_s14 }
 0x6f1   :  { %v403_v48 = vpop.permute.xlu0 %402 }
 0x6f2   :  { %v405_v49 = vadd.f32 %v403_v48, %v395_v47 }
 0x6f4   :  { %950 = vtanh.f32 %v405_v49 }
 0x6fe   :  { %v951_v50 = vpop.eup %950 }
 0x6ff   :  { %408 = vrot.lane.b32.xlu1 %v951_v50, %s1041_s14 }
 0x771   :  { %v409_v54 = vpop.permute.xlu1 %408 }
 0x772   :  { %v411_v55 = vmul.f32 %v409_v54, %v394_v53  ;;  %v558_v53 = vrot.slane %v1153_v27, 5 }
 0x774   :  { %v412_v56 = vpack.c.bf16 %v411_v55, %v411_v55 }
 0x776   :  { %904 = vmatmul.mubr.msk.bf16.vlgmr.msra.gmra.mrb[8].mxu0 %vm181_vm2, %v412_v56 }
 0x777   :  { %565 = vmatpush1.bf16.msra.mxu0 %v1089_v3  ;;  %596 = vmatprep.mubr.bf16.mxu0 %v1039_v0 }
 0x778   :  { %566 = vmatprep.subr.bf16.mxu0 %v1091_v4 }
 0x77b   :  { %567 = vmatpush1.bf16.msra.mxu0 %v1093_v5 }
 0x77c   :  { %568 = vmatprep.subr.bf16.mxu0 %v1098_v8 }
 0x77f   :  { %569 = vmatpush1.bf16.msra.mxu0 %v1108_v11 }
 0x780   :  { %570 = vmatprep.subr.bf16.mxu0 %v1112_v12 }
 0x783   :  { %571 = vmatpush1.bf16.msra.mxu0 %v1118_v13 }
 0x784   :  { %708 = vmatprep.subr.bf16.mxu0 %v1087_v2 }
 0x849   :  { %v454_v57 = vpop.f32.mrb[8].mxu0 }
 0x84a   :  { %v456_v59 = vpop.f32.mrb[9].mxu0  ;;  %v455_v6 = vadd.f32 %v454_v57, %v413_v1 }
 0x84b   :  { %v457_v60 = vadd.f32 %v456_v59, %v414_v58  ;;  %v458_v61 = vpop.f32.mrb[10].mxu0  ;;  %v557_v59 = vrot.slane %v1165_v39, 5 }
 0x84c   :  { %v459_v62 = vpop.f32.mrb[11].mxu0 }
 0x84d   :  { %952 = vtanh.f32 %v457_v60 }
 0x84e   :  { %954 = vtanh.f32 %v455_v6 }
 0x857   :  { %v953_v63 = vpop.eup %952 }
 0x858   :  { %469 = vrot.lane.b32.xlu0 %v953_v63, %s1041_s14  ;;  %v955_v7 = vpop.eup %954  ;;  %v464_v20 = vmul.f32 0.5, %v953_v63 }
 0x859   :  { %v463_v9 = vmul.f32 0.5, %v955_v7 }
 0x85a   :  { %v466_v21 = vadd.f32 0.5, %v464_v20 }
 0x85b   :  { %v465_v10 = vadd.f32 0.5, %v463_v9 }
 0x85d   :  { %v467_v16 = vmul.f32 %v465_v10, %v405_v49 }
 0x8ca   :  { %v470_v14 = vpop.permute.xlu0 %469 }
 0x8cb   :  { %v472_v15 = vmul.f32 %v470_v14, %v465_v10 }
 0x8cd   :  { %474 = vrot.lane.b32.xlu1 %v472_v15, %s1041_s14 }
 0x93f   :  { %v475_v17 = vpop.permute.xlu1 %474 }
 0x940   :  { %v477_v18 = vadd.f32 %v475_v17, %v467_v16 }
 0x942   :  { %956 = vtanh.f32 %v477_v18 }
 0x94c   :  { %v957_v19 = vpop.eup %956 }
 0x94d   :  { %480 = vrot.lane.b32.xlu0 %v957_v19, %s1041_s14 }
 0x9bf   :  { %v481_v22 = vpop.permute.xlu0 %480 }
 0x9c0   :  { %v483_v23 = vmul.f32 %v481_v22, %v466_v21  ;;  %v630_v21 = vrot.slane %v1153_v27, 6 }
 0x9c2   :  { %v484_v24 = vpack.c.bf16 %v483_v23, %v483_v23 }
 0x9c4   :  { %905 = vmatmul.mubr.msk.bf16.vlgmr.msra.gmra.mrb[8].mxu1 %vm181_vm2, %v484_v24 }
 0x9c5   :  { %637 = vmatpush1.bf16.msra.mxu1 %v1089_v3  ;;  %668 = vmatprep.mubr.bf16.mxu1 %v1039_v0 }
 0x9c6   :  { %638 = vmatprep.subr.bf16.mxu1 %v1091_v4 }
 0x9c9   :  { %639 = vmatpush1.bf16.msra.mxu1 %v1093_v5 }
 0x9ca   :  { %640 = vmatprep.subr.bf16.mxu1 %v1098_v8 }
 0x9cd   :  { %641 = vmatpush1.bf16.msra.mxu1 %v1108_v11 }
 0x9ce   :  { %642 = vmatprep.subr.bf16.mxu1 %v1112_v12 }
 0x9d1   :  { %643 = vmatpush1.bf16.msra.mxu1 %v1118_v13 }
 0x9d2   :  { %776 = vmatprep.subr.bf16.mxu1 %v1087_v2 }
 0xa97   :  { %v526_v25 = vpop.f32.mrb[8].mxu1 }
 0xa98   :  { %v528_v29 = vpop.f32.mrb[9].mxu1  ;;  %v527_v35 = vadd.f32 %v526_v25, %v485_v34 }
 0xa99   :  { %v529_v30 = vadd.f32 %v528_v29, %v486_v28  ;;  %v530_v31 = vpop.f32.mrb[10].mxu1 }
 0xa9a   :  { %v531_v32 = vpop.f32.mrb[11].mxu1 }
 0xa9b   :  { %958 = vtanh.f32 %v529_v30 }
 0xa9c   :  { %960 = vtanh.f32 %v527_v35 }
 0xaa5   :  { %v959_v33 = vpop.eup %958 }
 0xaa6   :  { %541 = vrot.lane.b32.xlu1 %v959_v33, %s1041_s14  ;;  %v961_v36 = vpop.eup %960  ;;  %v536_v46 = vmul.f32 0.5, %v959_v33 }
 0xaa7   :  { %v535_v37 = vmul.f32 0.5, %v961_v36 }
 0xaa8   :  { %v538_v47 = vadd.f32 0.5, %v536_v46 }
 0xaa9   :  { %v537_v40 = vadd.f32 0.5, %v535_v37 }
 0xaab   :  { %v539_v42 = vmul.f32 %v537_v40, %v477_v18 }
 0xb18   :  { %v542_v41 = vpop.permute.xlu1 %541 }
 0xb19   :  { %v544_v2 = vmul.f32 %v542_v41, %v537_v40  ;;  %v702_v40 = vrot.slane %v1153_v27, 7 }
 0xb1b   :  { %546 = vrot.lane.b32.xlu0 %v544_v2, %s1041_s14 }
 0xb8d   :  { %v547_v43 = vpop.permute.xlu0 %546 }
 0xb8e   :  { %v549_v44 = vadd.f32 %v547_v43, %v539_v42 }
 0xb90   :  { %962 = vtanh.f32 %v549_v44 }
 0xb9a   :  { %v963_v45 = vpop.eup %962 }
 0xb9b   :  { %552 = vrot.lane.b32.xlu1 %v963_v45, %s1041_s14  ;;  %v701_v45 = vrot.slane %v1165_v39, 7 }
 0xc0d   :  { %v553_v48 = vpop.permute.xlu1 %552 }
 0xc0e   :  { %v555_v49 = vmul.f32 %v553_v48, %v538_v47 }
 0xc10   :  { %v556_v50 = vpack.c.bf16 %v555_v49, %v555_v49 }
 0xc12   :  { %906 = vmatmul.mubr.msk.bf16.vlgmr.msra.gmra.mrb[12].mxu0 %vm181_vm2, %v556_v50 }
 0xc13   :  { %709 = vmatpush1.bf16.msra.mxu0 %v1089_v3  ;;  %740 = vmatprep.mubr.bf16.mxu0 %v1039_v0 }
 0xc14   :  { %710 = vmatprep.subr.bf16.mxu0 %v1091_v4 }
 0xc17   :  { %711 = vmatpush1.bf16.msra.mxu0 %v1093_v5 }
 0xc18   :  { %712 = vmatprep.subr.bf16.mxu0 %v1098_v8 }
 0xc1b   :  { %713 = vmatpush1.bf16.msra.mxu0 %v1108_v11 }
 0xc1c   :  { %714 = vmatprep.subr.bf16.mxu0 %v1112_v12 }
 0xc1f   :  { %715 = vmatpush1.bf16.msra.mxu0 %v1118_v13 }
 0xce5   :  { %v598_v52 = vpop.f32.mrb[12].mxu0 }
 0xce6   :  { %v600_v54 = vpop.f32.mrb[13].mxu0  ;;  %v599_v60 = vadd.f32 %v598_v52, %v557_v59 }
 0xce7   :  { %v601_v55 = vadd.f32 %v600_v54, %v558_v53  ;;  %v602_v56 = vpop.f32.mrb[14].mxu0 }
 0xce8   :  { %v603_v57 = vpop.f32.mrb[15].mxu0 }
 0xce9   :  { %964 = vtanh.f32 %v601_v55 }
 0xcea   :  { %966 = vtanh.f32 %v599_v60 }
 0xcf3   :  { %v965_v58 = vpop.eup %964 }
 0xcf4   :  { %613 = vrot.lane.b32.xlu0 %v965_v58, %s1041_s14  ;;  %v967_v61 = vpop.eup %966  ;;  %v608_v15 = vmul.f32 0.5, %v965_v58 }
 0xcf5   :  { %v607_v62 = vmul.f32 0.5, %v967_v61 }
 0xcf6   :  { %v610_v16 = vadd.f32 0.5, %v608_v15 }
 0xcf7   :  { %v609_v63 = vadd.f32 0.5, %v607_v62 }
 0xcf9   :  { %v611_v7 = vmul.f32 %v609_v63, %v549_v44 }
 0xd66   :  { %v614_v1 = vpop.permute.xlu0 %613 }
 0xd67   :  { %v616_v6 = vmul.f32 %v614_v1, %v609_v63 }
 0xd69   :  { %618 = vrot.lane.b32.xlu1 %v616_v6, %s1041_s14 }
 0xddb   :  { %v619_v9 = vpop.permute.xlu1 %618 }
 0xddc   :  { %v621_v10 = vadd.f32 %v619_v9, %v611_v7 }
 0xdde   :  { %968 = vtanh.f32 %v621_v10 }
 0xde8   :  { %v969_v14 = vpop.eup %968 }
 0xde9   :  { %624 = vrot.lane.b32.xlu0 %v969_v14, %s1041_s14 }
 0xe5b   :  { %v625_v17 = vpop.permute.xlu0 %624 }
 0xe5c   :  { %v627_v18 = vmul.f32 %v625_v17, %v610_v16 }
 0xe5e   :  { %v628_v19 = vpack.c.bf16 %v627_v18, %v627_v18 }
 0xe60   :  { %907 = vmatmul.mubr.msk.bf16.vlgmr.msra.gmra.mrb[12].mxu1 %vm181_vm2, %v628_v19 }
 0xe61   :  { %777 = vmatpush1.bf16.msra.mxu1 %v1089_v3  ;;  %808 = vmatprep.mubr.bf16.mxu1 %v1039_v0 }
 0xe62   :  { %778 = vmatprep.subr.bf16.mxu1 %v1091_v4  ;;  %v629_v4 = vrot.slane %v1165_v39, 6 }
 0xe65   :  { %779 = vmatpush1.bf16.msra.mxu1 %v1093_v5 }
 0xe66   :  { %780 = vmatprep.subr.bf16.mxu1 %v1098_v8 }
 0xe69   :  { %781 = vmatpush1.bf16.msra.mxu1 %v1108_v11 }
 0xe6a   :  { %782 = vmatprep.subr.bf16.mxu1 %v1112_v12 }
 0xe6d   :  { %783 = vmatpush1.bf16.msra.mxu1 %v1118_v13 }
 0xf33   :  { %v670_v20 = vpop.f32.mrb[12].mxu1 }
 0xf34   :  { %v672_v22 = vpop.f32.mrb[13].mxu1  ;;  %v671_v5 = vadd.f32 %v670_v20, %v629_v4 }
 0xf35   :  { %v673_v23 = vadd.f32 %v672_v22, %v630_v21  ;;  %v674_v3 = vpop.f32.mrb[14].mxu1 }
 0xf36   :  { %v675_v24 = vpop.f32.mrb[15].mxu1 }
 0xf37   :  { %970 = vtanh.f32 %v673_v23 }
 0xf38   :  { %972 = vtanh.f32 %v671_v5 }
 0xf41   :  { %v971_v0 = vpop.eup %970 }
 0xf42   :  { %685 = vrot.lane.b32.xlu1 %v971_v0, %s1041_s14  ;;  %v973_v8 = vpop.eup %972  ;;  %v680_v32 = vmul.f32 0.5, %v971_v0 }
 0xf43   :  { %v679_v11 = vmul.f32 0.5, %v973_v8 }
 0xf44   :  { %v682_v33 = vadd.f32 0.5, %v680_v32 }
 0xf45   :  { %v681_v12 = vadd.f32 0.5, %v679_v11 }
 0xf47   :  { %v683_v28 = vmul.f32 %v681_v12, %v621_v10 }
 0xfb4   :  { %v686_v25 = vpop.permute.xlu1 %685 }
 0xfb5   :  { %v688_v13 = vmul.f32 %v686_v25, %v681_v12 }
 0xfb7   :  { %690 = vrot.lane.b32.xlu0 %v688_v13, %s1041_s14 }
0x1029   :  { %v691_v29 = vpop.permute.xlu0 %690 }
0x102a   :  { %v693_v30 = vadd.f32 %v691_v29, %v683_v28 }
0x102c   :  { %974 = vtanh.f32 %v693_v30 }
0x1036   :  { %v975_v31 = vpop.eup %974 }
0x1037   :  { %696 = vrot.lane.b32.xlu1 %v975_v31, %s1041_s14 }
0x10a9   :  { %v697_v34 = vpop.permute.xlu1 %696 }
0x10aa   :  { %v699_v35 = vmul.f32 %v697_v34, %v682_v33 }
0x10ac   :  { %v700_v36 = vpack.c.bf16 %v699_v35, %v699_v35 }
0x10ae   :  { %908 = vmatmul.mubr.msk.bf16.vlgmr.msra.gmra.mrb[16].mxu0 %vm181_vm2, %v700_v36 }
0x1181   :  { %v742_v37 = vpop.f32.mrb[16].mxu0 }
0x1182   :  { %v744_v41 = vpop.f32.mrb[17].mxu0  ;;  %v743_v46 = vadd.f32 %v742_v37, %v701_v45 }
0x1183   :  { %v745_v2 = vadd.f32 %v744_v41, %v702_v40  ;;  %v746_v42 = vpop.f32.mrb[18].mxu0 }
0x1184   :  { %v747_v43 = vpop.f32.mrb[19].mxu0 }
0x1185   :  { %976 = vtanh.f32 %v745_v2 }
0x1186   :  { %978 = vtanh.f32 %v743_v46 }
0x118f   :  { %v977_v44 = vpop.eup %976 }
0x1190   :  { %757 = vrot.lane.b32.xlu0 %v977_v44, %s1041_s14  ;;  %v979_v47 = vpop.eup %978  ;;  %v752_v56 = vmul.f32 0.5, %v977_v44 }
0x1191   :  { %v751_v48 = vmul.f32 0.5, %v979_v47 }
0x1192   :  { %v754_v57 = vadd.f32 0.5, %v752_v56 }
0x1193   :  { %v753_v49 = vadd.f32 0.5, %v751_v48 }
0x1195   :  { %v755_v27 = vmul.f32 %v753_v49, %v693_v30 }
0x1202   :  { %v758_v50 = vpop.permute.xlu0 %757 }
0x1203   :  { %v760_v52 = vmul.f32 %v758_v50, %v753_v49 }
0x1205   :  { %762 = vrot.lane.b32.xlu1 %v760_v52, %s1041_s14 }
0x1277   :  { %v763_v53 = vpop.permute.xlu1 %762 }
0x1278   :  { %v765_v54 = vadd.f32 %v763_v53, %v755_v27 }
0x127a   :  { %980 = vtanh.f32 %v765_v54 }
0x1284   :  { %v981_v55 = vpop.eup %980 }
0x1285   :  { %768 = vrot.lane.b32.xlu0 %v981_v55, %s1041_s14 }
0x12f7   :  { %v769_v58 = vpop.permute.xlu0 %768 }
0x12f8   :  { %v771_v39 = vmul.f32 %v769_v58, %v754_v57 }
0x12fa   :  { %v772_v59 = vpack.c.bf16 %v771_v39, %v771_v39 }
0x12fc   :  { %909 = vmatmul.mubr.msk.bf16.vlgmr.msra.gmra.mrb[16].mxu1 %vm181_vm2, %v772_v59 }
0x13cf   :  { %v810_v60 = vpop.f32.mrb[16].mxu1 }
0x13d0   :  { %v812_v61 = vpop.f32.mrb[17].mxu1  ;;  %v811_v7 = vadd.f32 %v810_v60, %v1162_v38 }
0x13d1   :  { %v813_v62 = vadd.f32 %v812_v61, %v1150_v26  ;;  %v814_v63 = vpop.f32.mrb[18].mxu1  ;;  %v910_v26 = vld [vmem:[%s1296_s2 + $0x1] ss:$0 sm:$0xff]  ;;  %s1042_s2 = smov 96  }
0x13d2   :  { %v815_v1 = vpop.f32.mrb[19].mxu1 }
0x13d3   :  { %982 = vtanh.f32 %v813_v62 }
0x13d4   :  { %984 = vtanh.f32 %v811_v7 }
0x13dd   :  { %v983_v6 = vpop.eup %982 }
0x13de   :  { %825 = vrot.lane.b32.xlu1 %v983_v6, %s1041_s14  ;;  %v985_v9 = vpop.eup %984  ;;  %v820_v38 = vmul.f32 0.5, %v983_v6 }
0x13df   :  { %v819_v10 = vmul.f32 0.5, %v985_v9 }
0x13e0   :  { %v822_v21 = vadd.f32 0.5, %v820_v38 }
0x13e1   :  { %v821_v14 = vadd.f32 0.5, %v819_v10 }
0x13e3   :  { %v823_v17 = vmul.f32 %v821_v14, %v765_v54 }
0x1450   :  { %v826_v15 = vpop.permute.xlu1 %825 }
0x1451   :  { %v828_v16 = vmul.f32 %v826_v15, %v821_v14 }
0x1453   :  { %830 = vrot.lane.b32.xlu0 %v828_v16, %s1041_s14 }
0x1457   :  { %852 = vrot.lane.b32.xlu0 %v910_v26, %s1040_s5 }
0x14c5   :  { %v831_v18 = vpop.permute.xlu0 %830 }
0x14c6   :  { %v833_v19 = vadd.f32 %v831_v18, %v823_v17 }
0x14c8   :  { %986 = vtanh.f32 %v833_v19 }
0x14c9   :  { %v853_v24 = vpop.permute.xlu0 %852 }
0x14d2   :  { %v987_v20 = vpop.eup %986 }
0x14d3   :  { %836 = vrot.lane.b32.xlu1 %v987_v20, %s1041_s14 }
0x1545   :  { %v837_v22 = vpop.permute.xlu1 %836 }
0x1546   :  { %v839_v23 = vmul.f32 %v837_v22, %v822_v21 }
0x1548   :  { %v843_v3 = vsel %vm842_vm6, %v839_v23, %v771_v39 }
0x1549   :  { %vm844_vm7 = vcmp.gt.f32.partialorder %v843_v3, 0.0  ;;  %v845_v0 = vmul.f32 0.01, %v843_v3 }
0x154b   :  { %v846_v4 = vsel %vm844_vm7, %v843_v3, %v845_v0 }
0x154c   :  { %v855_v5 = vmul.f32 %v853_v24, %v846_v4 }
0x154e   :  { %857 = vrot.lane.b32.xlu1 %v855_v5, %s1042_s2 }
0x1552   :  { %864 = vrot.lane.b32.xlu1 %v910_v26, %s1042_s2 }
0x15c0   :  { %v858_v8 = vpop.permute.xlu1 %857 }
0x15c1   :  { %v861_v11 = vsel %vm860_vm8, %v858_v8, 0.0 }
0x15c2   :  { %862 = vadd.xlane.f32.xlu0 %v861_v11 }
0x15c4   :  { %v865_v12 = vpop.permute.xlu1 %864 }
0x164f   :  { %v863_v51 = vpop.xlane.xlu0 %862 }
0x1650   :  { %v867_v25 = vadd.f32 %v865_v12, %v863_v51 }
0x1652   :  { %869 = vst.msk [vmem:[#allocation5] sm:$0x1] %vm868_vm9, %v867_v25 }
0x1653   :  { %1021 = shalt.err (!%p1018_p12)
}
0x1654   :  { %s1022_s22 = scalar_lea.hbm %s1298_s4, 16 }
0x1655   :  { %p1023_p13 = scmp.ne.s32.totalorder %s1298_s4, %s1022_s22  ;;  %p1026_p0 = scmp.lt.u32.totalorder %s1022_s22, %s1298_s4 }
0x1657   :  { %p1028_p1 = pnand %p1026_p0, %p1023_p13 }
0x1659   :  { %1031 = shalt.err (!%p1028_p1)
}
0x165a   :  { %879 = dma.vmem_to_hbm [thread:$0]  %s877_s17, 16, %s1298_s4, [#allocation4]  }
0x165b   :  { %1034 = dma.done.wait [#allocation4], 16  }
0x165c   :  { %1035 = vsyncadd [#allocation4], 4294967280 }
0x165d   :  { %883 = vsyncpa [#allocation3], 1 }
0x165e   :  { %884 = vsyncpa [#allocation4], 1 }

</bundles_post_ra>
